<compile_context>
chip_gen: v5e
topology: v5e:2x2
jax: 0.10.0
libtpu: 0.0.40
codegen_flags: <defaults>
</compile_context>

<pallas_src>
import jax
import jax.numpy as jnp
from jax.experimental import pallas as pl
from jax.experimental.pallas import tpu as pltpu


def chess_net_kernel(x_ref, w1_ref, b1_ref, w2_ref, b2_ref, o_ref):
    # In-kernel cast of the f32 activation tile to bf16 for the MXU; the cast
    # co-issues on the VALU slot and is hidden under the matmul.
    x_bf = x_ref[...].astype(jnp.bfloat16)
    # fc1: bf16 x bf16 -> f32 accumulate on the MXU.
    h = jnp.dot(x_bf, w1_ref[...], preferred_element_type=jnp.float32)
    # Bias + tanh in f32 (v5e VPU/EUP have no bf16 path; cost is unmeasurable).
    h = jnp.tanh(h + b1_ref[...])
    # fc2 (out_features=1) as VPU multiply + XLU lane reduction against the
    # (1, H) w2 row; b2 is a scalar read from 1D SMEM.
    out = jnp.sum(h * w2_ref[...], axis=-1, keepdims=True) + b2_ref[0]
    o_ref[...] = out.astype(o_ref.dtype)


def prepare_params(w1_t, b1, w2_t, b2):
    """One-time conversion of torch-layout params into kernel-ready form.

    w1_t: [F, H] (fc1 weight, already transposed to [in, out])
    b1:   [H]
    w2_t: [H, 1] (fc2 weight transposed)
    b2:   [1]
    """
    H = w1_t.shape[1]
    return {
        "w1": w1_t.astype(jnp.bfloat16),                 # (F, H) bf16 MXU operand
        "b1": b1.reshape(1, H).astype(jnp.float32),      # (1, H) f32 row
        "w2": w2_t.reshape(1, H).astype(jnp.float32),    # (H, 1) column -> (1, H) row
        "b2": b2.reshape(1).astype(jnp.float32),         # 1D f32[1] for SMEM
    }


def _pick_batch_tile(B, tb):
    if B <= tb:
        return B  # single full-array block (always a legal block shape)
    return max(8, (tb // 8) * 8)  # keep the (8, 128) block constraint


def chess_net_forward(x_flat, params, *, tb=512):
    """x_flat: [B, F] float32 (row-major NCHW flatten done by the producer).

    Returns [B, 1] float32.
    """
    B, F = x_flat.shape
    H = params["w1"].shape[1]

    TB = _pick_batch_tile(B, tb)
    grid = (pl.cdiv(B, TB),)

    bytes_accessed = (
        B * F * 4          # x (f32, cast in-kernel)
        + F * H * 2        # w1 (bf16, resident across batch tiles)
        + H * 4            # b1 (f32)
        + H * 4            # w2 row (f32)
        + 4                # b2
        + B * 4            # output
    )

    return pl.pallas_call(
        chess_net_kernel,
        out_shape=jax.ShapeDtypeStruct((B, 1), jnp.float32),
        grid=grid,
        in_specs=[
            # x: tiled over the batch axis.
            pl.BlockSpec((TB, F), lambda i: (i, 0)),
            # Weights: constant block index -> VMEM-resident across all tiles.
            pl.BlockSpec((F, H), lambda i: (0, 0)),
            pl.BlockSpec((1, H), lambda i: (0, 0)),
            pl.BlockSpec((1, H), lambda i: (0, 0)),
            # b2: 1D scalar in SMEM.
            pl.BlockSpec(memory_space=pltpu.MemorySpace.SMEM),
        ],
        out_specs=pl.BlockSpec((TB, 1), lambda i: (i, 0)),
        compiler_params=pltpu.CompilerParams(
            dimension_semantics=("parallel",)),  # shards batch tiles across TCs on v7x
        cost_estimate=pl.CostEstimate(
            flops=2 * B * F * H + 2 * B * H,
            transcendentals=B * H,
            bytes_accessed=bytes_accessed,
        ),
    )(x_flat, params["w1"], params["b1"], params["w2"], params["b2"])


if __name__ == "__main__":
    # problem_size not starting with 'N' -> board_size=4, piece_size=8 -> F=128
    board_size = 4
    piece_size = 8
    in_features = piece_size * board_size * board_size  # 128
    hidden = 128
    out_features = 1
    batch = 8

    key = jax.random.PRNGKey(0)
    k_x, k_w1, k_b1, k_w2, k_b2 = jax.random.split(key, 5)

    x = jax.random.normal(
        k_x, (batch, piece_size, board_size, board_size), dtype=jnp.float32)

    # Deterministic synthetic parameters (fc weights stored transposed: [in, out]).
    w1_t = jax.random.normal(k_w1, (in_features, hidden), dtype=jnp.float32) * 0.05
    b1 = jax.random.normal(k_b1, (hidden,), dtype=jnp.float32) * 0.05
    w2_t = jax.random.normal(k_w2, (hidden, out_features), dtype=jnp.float32) * 0.05
    b2 = jax.random.normal(k_b2, (out_features,), dtype=jnp.float32) * 0.05

    # One-time param prep (hoisted out of the per-call forward).
    params = prepare_params(w1_t, b1, w2_t, b2)
    params = jax.block_until_ready(params)

    # Row-major NCHW flatten (same semantics as torch .reshape), done once at
    # the producer rather than inside every forward call.
    x_flat = x.reshape(batch, in_features)

    out = chess_net_forward(x_flat, params)
    out = jax.block_until_ready(out)
    assert out.shape == (batch, out_features)

    # Reference matching the kernel's precision (bf16 MXU operands, f32 accumulate).
    h_ref = jnp.tanh(
        jnp.dot(x_flat.astype(jnp.bfloat16), w1_t.astype(jnp.bfloat16),
                preferred_element_type=jnp.float32) + b1)
    ref_bf16 = h_ref @ w2_t + b2
    assert jnp.allclose(out, ref_bf16, atol=1e-4, rtol=1e-4)

    # Loose sanity check against the full-f32 PyTorch-equivalent forward.
    ref_f32 = jnp.tanh(x_flat @ w1_t + b1) @ w2_t + b2
    assert jnp.allclose(out, ref_f32, atol=5e-2, rtol=5e-2)

    print("KERNEL_OK")
</pallas_src>

<mosaic_0001>
module attributes {stable_mosaic.version = 11 : i64} {
  func.func @chess_net_kernel(%arg0: i32, %arg1: memref<8x128xf32, #tpu.memory_space<vmem>>, %arg2: memref<128x128xbf16, #tpu.memory_space<vmem>>, %arg3: memref<1x128xf32, #tpu.memory_space<vmem>>, %arg4: memref<1x128xf32, #tpu.memory_space<vmem>>, %arg5: memref<1xf32, #tpu.memory_space<smem>>, %arg6: memref<8x1xf32, #tpu.memory_space<vmem>>) attributes {dimension_semantics = [#tpu.dimension_semantics<parallel>], iteration_bounds = array<i64: 1>, scalar_prefetch = 0 : i64, scratch_operands = 0 : i64, tpu.core_type = #tpu.core_type<tc>, window_params = [{transform_indices = @transform_0, window_bounds = array<i64: 8, 128>}, {pipeline_mode = #tpu.pipeline_mode<synchronous>, transform_indices = @transform_1, window_bounds = array<i64: 128, 128>}, {pipeline_mode = #tpu.pipeline_mode<synchronous>, transform_indices = @transform_2, window_bounds = array<i64: 1, 128>}, {pipeline_mode = #tpu.pipeline_mode<synchronous>, transform_indices = @transform_3, window_bounds = array<i64: 1, 128>}, {transform_indices = @transform_4, window_bounds = array<i64: 1>}, {transform_indices = @transform_5, window_bounds = array<i64: 8, 1>}]} {
    %c0 = arith.constant 0 : index
    %c0_0 = arith.constant 0 : index
    %0 = vector.load %arg1[%c0, %c0_0] : memref<8x128xf32, #tpu.memory_space<vmem>>, vector<8x128xf32>
    %1 = arith.truncf %0 : vector<8x128xf32> to vector<8x128xbf16>
    %c0_1 = arith.constant 0 : index
    %c0_2 = arith.constant 0 : index
    %2 = vector.load %arg2[%c0_1, %c0_2] : memref<128x128xbf16, #tpu.memory_space<vmem>>, vector<128x128xbf16>
    %cst = arith.constant dense<0.000000e+00> : vector<8x128xf32>
    %3 = tpu.matmul %1, %2, %cst {dimension_numbers = #tpu.dot_dimension_numbers<[1], [0], [0], [1], [0, 0, 1, 1], [], []>} : vector<8x128xbf16>, vector<128x128xbf16>, vector<8x128xf32> -> vector<8x128xf32>
    %c0_3 = arith.constant 0 : index
    %c0_4 = arith.constant 0 : index
    %4 = vector.load %arg3[%c0_3, %c0_4] : memref<1x128xf32, #tpu.memory_space<vmem>>, vector<1x128xf32>
    %5 = vector.broadcast %4 : vector<1x128xf32> to vector<8x128xf32>
    %6 = arith.addf %3, %5 : vector<8x128xf32>
    %7 = math.tanh %6 : vector<8x128xf32>
    %c0_5 = arith.constant 0 : index
    %c0_6 = arith.constant 0 : index
    %8 = vector.load %arg4[%c0_5, %c0_6] : memref<1x128xf32, #tpu.memory_space<vmem>>, vector<1x128xf32>
    %9 = vector.broadcast %8 : vector<1x128xf32> to vector<8x128xf32>
    %10 = arith.mulf %7, %9 : vector<8x128xf32>
    %cst_7 = arith.constant dense<0.000000e+00> : vector<8xf32>
    %11 = vector.multi_reduction <add>, %10, %cst_7 [1] : vector<8x128xf32> to vector<8xf32>
    %12 = vector.shape_cast %11 : vector<8xf32> to vector<8x1xf32>
    %c0_8 = arith.constant 0 : index
    %13 = memref.load %arg5[%c0_8] : memref<1xf32, #tpu.memory_space<smem>>
    %14 = vector.broadcast %13 : f32 to vector<8x1xf32>
    %15 = arith.addf %12, %14 : vector<8x1xf32>
    %c0_9 = arith.constant 0 : index
    %c0_10 = arith.constant 0 : index
    %16 = vector.load %arg6[%c0_9, %c0_10] : memref<8x1xf32, #tpu.memory_space<vmem>>, vector<8x1xf32>
    tpu.vector_store %arg6[%c0_9, %c0_10], %15 {strides = array<i32>} : memref<8x1xf32, #tpu.memory_space<vmem>>, vector<8x1xf32>,
    return
  }
  func.func @transform_0(%arg0: i32) -> (i32, i32) {
    %c0_i32 = arith.constant 0 : i32
    %c0_i32_0 = arith.constant 0 : i32
    return %arg0, %c0_i32 : i32, i32
  }
  func.func @transform_1(%arg0: i32) -> (i32, i32) {
    %c0_i32 = arith.constant 0 : i32
    %c0_i32_0 = arith.constant 0 : i32
    %c0_i32_1 = arith.constant 0 : i32
    return %c0_i32, %c0_i32_0 : i32, i32
  }
  func.func @transform_2(%arg0: i32) -> (i32, i32) {
    %c0_i32 = arith.constant 0 : i32
    %c0_i32_0 = arith.constant 0 : i32
    %c0_i32_1 = arith.constant 0 : i32
    return %c0_i32, %c0_i32_0 : i32, i32
  }
  func.func @transform_3(%arg0: i32) -> (i32, i32) {
    %c0_i32 = arith.constant 0 : i32
    %c0_i32_0 = arith.constant 0 : i32
    %c0_i32_1 = arith.constant 0 : i32
    return %c0_i32, %c0_i32_0 : i32, i32
  }
  func.func @transform_4(%arg0: i32) -> i32 {
    %c0_i32 = arith.constant 0 : i32
    %c0_i32_0 = arith.constant 0 : i32
    return %c0_i32 : i32
  }
  func.func @transform_5(%arg0: i32) -> (i32, i32) {
    %c0_i32 = arith.constant 0 : i32
    %c0_i32_0 = arith.constant 0 : i32
    return %arg0, %c0_i32 : i32, i32
  }
}

</mosaic_0001>

<bundles_post_ra>
// kernel: tpu_custom_call.1
= control target key start
LH: loop header
LB: loop body
LE: loop exit
PB: predicated region body
PF: predicated region fallthrough
CT: control target
= control target key end

     0   :  { %11 = vsyncpa [#allocation4], 0  ;;  %s305_s0 = inlined_call_operand.hbm [shape: f32[8,128], index: 0, kind: input, shape index: {}]   ;;  %s306_s1 = inlined_call_operand.hbm [shape: bf16[128,128], index: 1, kind: input, shape index: {}]   ;;  %s307_s2 = inlined_call_operand.vmem [shape: f32[1,128], index: 2, kind: input, shape index: {}]   ;;  %s308_s3 = inlined_call_operand.vmem [shape: f32[1,128], index: 3, kind: input, shape index: {}]   ;;  %s309_s4 = inlined_call_operand.<no memory space> [shape: f32[1], index: 4, kind: input, shape index: {}]   ;;  %s310_s5 = inlined_call_operand.vmem [shape: f32[8,1], index: 5, kind: output, shape index: {}]  }
   0x1   :  { %s18_s20 = sshll.u32 %s305_s0, 4  ;;  %s19_s20 = int_to_ptr.hbm [resolvable:$true] %s18_s20 }
   0x2   :  { %12 = vsyncpa [#allocation6], 0  ;;  %s253_s21 = smov [#allocation3]   ;;  %s28_s25 = sshll.u32 %s306_s1, 4  ;;  %s29_s25 = int_to_ptr.hbm [resolvable:$true] %s28_s25 }
   0x3   :  { %s20_s22 = sshll.u32 %s253_s21, 4  ;;  %s254_s26 = smov [#allocation5]   ;;  %s21_s22 = int_to_ptr.vmem [resolvable:$true] %s20_s22 }
   0x4   :  { %23 = dma.hbm_to_vmem [thread:$0]  %s19_s20, 128, %s21_s22, [#allocation4]  }
   0x5   :  { %s30_s27 = sshll.u32 %s254_s26, 4  ;;  %s255_s28 = smov 64   ;;  %s31_s27 = int_to_ptr.vmem [resolvable:$true] %s30_s27 }
   0x6   :  { %s256_s29 = smov 4  }
   0x7   :  { %36 = dma.hbm_to_vmem [thread:$0]  %s29_s25, 1024, %s31_s27, [#allocation6], %s255_s28, %s255_s28, %s256_s29  }
   0x8   :  { %249 = dma.done.wait [#allocation4], 128  }
   0x9   :  { %250 = vsyncadd [#allocation4], 4294967168 }
   0xa   :  { %251 = dma.done.wait [#allocation6], 1024  }
   0xb   :  { %252 = vsyncadd [#allocation6], 4294966272  ;;  %v192_v0 = vld [vmem:[#allocation5 + $0x38] sm:$0xff]  ;;  %v191_v1 = vld [vmem:[#allocation5 + $0x30] sm:$0xff]  ;;  %v143_v17 = vstv %s309_s4  ;;  %vm145_vm0 = vcmask 7168  }
   0xc   :  { %121 = vmatpush.bf16.msra.mxu0 %v192_v0  ;;  %v190_v2 = vld [vmem:[#allocation5 + $0x28] sm:$0xff]  ;;  %v189_v3 = vld [vmem:[#allocation5 + $0x20] sm:$0xff]  ;;  %v188_v4 = vld [vmem:[#allocation5 + $0x18] sm:$0xff] }
   0xd   :  { %v187_v5 = vld [vmem:[#allocation5 + $0x10] sm:$0xff]  ;;  %v186_v6 = vld [vmem:[#allocation5 + $0x8] sm:$0xff]  ;;  %v185_v7 = vld [vmem:[#allocation5] sm:$0xff] }
   0xe   :  { %v51_v8 = vld [vmem:[#allocation3] sm:$0xff] }
   0xf   :  { %v52_v9 = vpack.c.bf16 %v51_v8, %v51_v8  ;;  %v197_v10 = vld [vmem:[%s307_s2] ss:$0 sm:$0xff] }
  0x10   :  { %122 = vmatpush.bf16.msra.mxu0 %v191_v1  ;;  %v198_v13 = vld [vmem:[%s308_s3] ss:$0 sm:$0xff] }
  0x14   :  { %123 = vmatpush.bf16.msra.mxu0 %v190_v2 }
  0x18   :  { %124 = vmatpush.bf16.msra.mxu0 %v189_v3 }
  0x1c   :  { %125 = vmatpush.bf16.msra.mxu0 %v188_v4 }
  0x20   :  { %126 = vmatpush.bf16.msra.mxu0 %v187_v5 }
  0x24   :  { %127 = vmatpush.bf16.msra.mxu0 %v186_v6 }
  0x28   :  { %128 = vmatpush.bf16.msra.mxu0 %v185_v7 }
  0x2b   :  { %129 = vmatmul.bf16.vlgmr.msra.gmra.mxu0 %v52_v9 }
  0xa8   :  { %v130_v11 = vpop.f32.mrf.mxu0 }
  0xa9   :  { %v131_v12 = vadd.f32 %v197_v10, %v130_v11 }
  0xab   :  { %199 = vtanh.f32 %v131_v12 }
  0xb0   :  { %v132_v14 = vpop.f32.mrf.mxu0 }
  0xb1   :  { %v200_v15 = vpop.eup %199 }
  0xb2   :  { %v139_v16 = vmul.f32 %v200_v15, %v198_v13 }
  0xb4   :  { %140 = vadd.xlane.f32.xlu0 %v139_v16 }
 0x127   :  { %v141_v18 = vpop.xlane.xlu0 %140 }
 0x128   :  { %v144_v19 = vadd.f32 %v143_v17, %v141_v18 }
 0x12a   :  { %146 = vst.msk [vmem:[%s310_s5] sm:$0xff] %vm145_vm0, %v144_v19 }
 0x12b   :  { %151 = vsyncpa [#allocation4], 1 }
 0x12c   :  { %152 = vsyncpa [#allocation6], 1 }

</bundles_post_ra>
